<compile_context>
chip_gen: v5e
topology: v5e:2x2
jax: 0.10.0
libtpu: 0.0.40
codegen_flags: <defaults>
</compile_context>

<pallas_src>
import math

import jax
import jax.numpy as jnp
from jax.experimental import pallas as pl
from jax.experimental.pallas import tpu as pltpu

_MIB = 1024 * 1024
_SQUEEZE = pl.Squeezed() if hasattr(pl, "Squeezed") else None


# --------------------------------------------------------------------------- #
# Kernels
# --------------------------------------------------------------------------- #
def _pe_add_kernel_whole(x_ref, pe_ref, o_ref):
    """x_ref/o_ref: (TR, C) tile of one batch element; pe_ref: (R, C) whole table."""
    tr = x_ref.shape[0]
    start = pl.multiple_of(pl.program_id(0) * tr, tr)
    pe = pe_ref[pl.ds(start, tr), :]                       # f32 slice of the table
    o_ref[...] = (x_ref[...].astype(jnp.float32) + pe).astype(o_ref.dtype)


def _pe_add_kernel_tiled(x_ref, pe_ref, o_ref):
    """x_ref/pe_ref/o_ref: (TR, C) tiles; pe tile is batch-invariant (reused)."""
    o_ref[...] = (x_ref[...].astype(jnp.float32) + pe_ref[...]).astype(o_ref.dtype)


# --------------------------------------------------------------------------- #
# Helpers
# --------------------------------------------------------------------------- #
def _build_pe(seq_len, d_model):
    """First `seq_len` rows of the PyTorch PositionalEncoding table (float32)."""
    position = jnp.arange(seq_len, dtype=jnp.float32)[:, None]              # (S, 1)
    div_term = jnp.exp(jnp.arange(0, d_model, 2, dtype=jnp.float32)
                       * (-math.log(10000.0) / d_model))                    # (ceil(D/2),)
    angles = position * div_term                                            # (S, ceil(D/2))
    # Interleave: even feature columns = sin, odd feature columns = cos.
    pe = jnp.stack([jnp.sin(angles), jnp.cos(angles)], axis=-1)
    return pe.reshape(seq_len, -1)[:, :d_model]


def _lane_dense_view(seq_len, d_model, max_lane=1024):
    """(R, C) refold of the per-batch (S, D) slab with C a multiple of 128."""
    n = seq_len * d_model
    if d_model % 128 == 0:
        return seq_len, d_model
    if n % 128 == 0:
        c = 128
        while c * 2 <= min(n, max_lane) and n % (c * 2) == 0:
            c *= 2
        return n // c, c
    # TODO(synk): pad the flattened slab to a multiple of 128 lanes (masked
    # tail) instead of falling back to sub-128 lane width / vst.msk stores.
    return seq_len, d_model


def _vmem_capacity_bytes():
    try:
        return int(pltpu.get_tpu_info().vmem_capacity_bytes)
    except Exception:
        return 64 * _MIB            # conservative default: v7x physical VMEM


def _row_tile(rows, row_cap):
    """Largest legal row tile: divisor of rows, multiple of 8, <= row_cap,
    or the full extent (always legal per the (8,128) rule)."""
    row_cap = max(1, row_cap)
    if rows <= row_cap:
        return rows
    t = (row_cap // 8) * 8
    while t >= 8:
        if rows % t == 0:
            return t
        t -= 8
    # TODO(synk): masked ragged tail instead of full-extent fallback when
    # `rows` has no multiple-of-8 divisor under the VMEM cap.
    return rows


# --------------------------------------------------------------------------- #
# Wrapper
# --------------------------------------------------------------------------- #
def positional_encoding(x, max_len=5000):
    """x: (B, S, D) -> x + pe[None, :S, :], matching the PyTorch module."""
    B, S, D = x.shape
    assert S <= max_len

    out_dtype = jnp.promote_types(x.dtype, jnp.float32)    # PyTorch: x + f32 table
    pe = _build_pe(S, D)                                   # (S, D) float32, built once

    R, C = _lane_dense_view(S, D)
    # Contiguous refolds of the trailing dims -> bitcast views, no extra HBM pass.
    x_view = x.reshape(B, R, C)
    pe_view = pe.reshape(R, C)

    x_itm = jnp.dtype(x.dtype).itemsize
    o_itm = jnp.dtype(out_dtype).itemsize
    pe_total_bytes = R * C * 4
    pe_whole = pe_total_bytes <= 2 * _MIB                  # whole-table VMEM residency

    # --- VMEM budget & tile sizing (generation aware) ------------------------
    vmem_cap = _vmem_capacity_bytes()
    vmem_budget = int(min(max(vmem_cap // 2, 32 * _MIB), 64 * _MIB))
    slack = 4 * _MIB
    # Per row of a tile: double-buffered x + double-buffered out (+ pe tile if tiled).
    bytes_per_row = 2 * C * x_itm + 2 * C * o_itm + (0 if pe_whole else 2 * C * 4)
    fixed = slack + (2 * pe_total_bytes if pe_whole else 0)
    rows_by_vmem = max(1, (vmem_budget - fixed) // bytes_per_row)
    rows_by_tile = max(1, (8 * _MIB) // (C * x_itm))       # cap a single x tile ~8 MiB
    TR = _row_tile(R, min(R, rows_by_vmem, rows_by_tile))

    # Guarantee >=2 grid steps so megacore (v7x: 2 TCs) has work to shard.
    if B * (R // TR) < 2:
        t = (TR // 2 // 8) * 8
        while t >= 8:
            if R % t == 0:
                TR = t
                break
            t -= 8

    grid = (R // TR, B)                                    # batch innermost
    vmem_needed = bytes_per_row * TR + fixed
    vmem_limit = int(min(max(vmem_needed, 32 * _MIB),
                         max(vmem_cap - 8 * _MIB, 32 * _MIB)))

    x_spec = pl.BlockSpec((_SQUEEZE, TR, C), lambda r, b: (b, r, 0))
    o_spec = pl.BlockSpec((_SQUEEZE, TR, C), lambda r, b: (b, r, 0))
    if pe_whole:
        pe_spec = pl.BlockSpec((R, C), lambda r, b: (0, 0))    # single DMA, reused
        kernel = _pe_add_kernel_whole
    else:
        pe_spec = pl.BlockSpec((TR, C), lambda r, b: (r, 0))   # batch-invariant tile
        kernel = _pe_add_kernel_tiled

    # In-place add over x's HBM buffer when dtypes allow (XLA inserts a copy if
    # the caller did not donate x, so this is always safe).
    aliases = {0: 0} if jnp.dtype(x.dtype) == jnp.dtype(out_dtype) else {}

    out_view = pl.pallas_call(
        kernel,
        out_shape=jax.ShapeDtypeStruct((B, R, C), out_dtype),
        grid_spec=pltpu.PrefetchScalarGridSpec(
            num_scalar_prefetch=0,
            grid=grid,
            in_specs=[x_spec, pe_spec],
            out_specs=o_spec,
        ),
        input_output_aliases=aliases,
        compiler_params=pltpu.CompilerParams(
            dimension_semantics=("parallel", "parallel"),
            vmem_limit_bytes=vmem_limit,
        ),
    )(x_view, pe_view)

    return out_view.reshape(B, S, D)


# --------------------------------------------------------------------------- #
# Pure-JAX reference (mirrors the PyTorch module exactly)
# --------------------------------------------------------------------------- #
def _reference_pe_add(x, max_len=5000):
    B, S, D = x.shape
    position = jnp.arange(0, max_len, dtype=jnp.float32)[:, None]
    div_term = jnp.exp(jnp.arange(0, D, 2, dtype=jnp.float32)
                       * (-math.log(10000.0) / D))
    pe = jnp.zeros((max_len, D), dtype=jnp.float32)
    pe = pe.at[:, 0::2].set(jnp.sin(position * div_term))
    pe = pe.at[:, 1::2].set(jnp.cos(position * div_term))
    return x + pe[None, :S, :]


if __name__ == "__main__":
    key = jax.random.PRNGKey(0)
    B, S, D = 2, 8, 32                     # batch, seq, d_model
    x = jax.random.normal(key, (B, S, D), dtype=jnp.float32)

    # Reference computed before the (possibly in-place-aliasing) kernel call.
    ref = jax.block_until_ready(_reference_pe_add(x))

    out = positional_encoding(x)
    out = jax.block_until_ready(out)

    assert out.shape == (B, S, D)
    assert out.dtype == ref.dtype
    assert jnp.allclose(out, ref, atol=1e-5, rtol=1e-5), "mismatch vs reference"

    print("KERNEL_OK")
</pallas_src>

<mosaic_0001>
module attributes {stable_mosaic.version = 11 : i64} {
  func.func @_pe_add_kernel_whole(%arg0: i32, %arg1: i32, %arg2: memref<1x1x256xf32, #tpu.memory_space<vmem>>, %arg3: memref<1x256xf32, #tpu.memory_space<vmem>>, %arg4: memref<1x1x256xf32, #tpu.memory_space<vmem>>) attributes {dimension_semantics = [#tpu.dimension_semantics<parallel>, #tpu.dimension_semantics<parallel>], iteration_bounds = array<i64: 1, 2>, scalar_prefetch = 0 : i64, scratch_operands = 0 : i64, tpu.core_type = #tpu.core_type<tc>, window_params = [{transform_indices = @transform_0, window_bounds = array<i64: 1, 1, 256>}, {pipeline_mode = #tpu.pipeline_mode<synchronous>, transform_indices = @transform_1, window_bounds = array<i64: 1, 256>}, {transform_indices = @transform_2, window_bounds = array<i64: 1, 1, 256>}]} {
    %c1_i32 = arith.constant 1 : i32
    %0 = arith.muli %arg0, %c1_i32 : i32
    %1 = tpu.assume_multiple %0, 1 : i32
    %2 = arith.index_cast %1 : i32 to index
    %c0 = arith.constant 0 : index
    %3 = vector.load %arg3[%2, %c0] : memref<1x256xf32, #tpu.memory_space<vmem>>, vector<1x256xf32>
    %c0_0 = arith.constant 0 : index
    %c0_1 = arith.constant 0 : index
    %c0_2 = arith.constant 0 : index
    %4 = vector.load %arg2[%c0_0, %c0_1, %c0_2] : memref<1x1x256xf32, #tpu.memory_space<vmem>>, vector<1x1x256xf32>
    %5 = vector.shape_cast %4 : vector<1x1x256xf32> to vector<1x256xf32>
    %6 = arith.addf %5, %3 : vector<1x256xf32>
    %c0_3 = arith.constant 0 : index
    %c0_4 = arith.constant 0 : index
    %c0_5 = arith.constant 0 : index
    %7 = vector.load %arg4[%c0_3, %c0_4, %c0_5] : memref<1x1x256xf32, #tpu.memory_space<vmem>>, vector<1x1x256xf32>
    %8 = vector.shape_cast %7 : vector<1x1x256xf32> to vector<1x256xf32>
    %9 = vector.shape_cast %6 : vector<1x256xf32> to vector<1x1x256xf32>
    tpu.vector_store %arg4[%c0_3, %c0_4, %c0_5], %9 {strides = array<i32>} : memref<1x1x256xf32, #tpu.memory_space<vmem>>, vector<1x1x256xf32>,
    return
  }
  func.func @transform_0(%arg0: i32, %arg1: i32) -> (i32, i32, i32) {
    %c0_i32 = arith.constant 0 : i32
    %c0_i32_0 = arith.constant 0 : i32
    return %arg1, %arg0, %c0_i32 : i32, i32, i32
  }
  func.func @transform_1(%arg0: i32, %arg1: i32) -> (i32, i32) {
    %c0_i32 = arith.constant 0 : i32
    %c0_i32_0 = arith.constant 0 : i32
    %c0_i32_1 = arith.constant 0 : i32
    return %c0_i32, %c0_i32_0 : i32, i32
  }
  func.func @transform_2(%arg0: i32, %arg1: i32) -> (i32, i32, i32) {
    %c0_i32 = arith.constant 0 : i32
    %c0_i32_0 = arith.constant 0 : i32
    return %arg1, %arg0, %c0_i32 : i32, i32, i32
  }
}

</mosaic_0001>

<bundles_post_ra>
// kernel: tpu_custom_call.1
= control target key start
LH: loop header
LB: loop body
LE: loop exit
PB: predicated region body
PF: predicated region fallthrough
CT: control target
= control target key end

     0   :  { %7 = vsyncpa [#allocation3], 0  ;;  %s618_s0 = inlined_call_operand.hbm [shape: f32[2,1,256], index: 0, kind: input, shape index: {}, may-alias: {0,2}]   ;;  %s619_s1 = inlined_call_operand.vmem [shape: f32[1,256], index: 1, kind: input, shape index: {}]   ;;  %s620_s2 = inlined_call_operand.hbm [shape: f32[2,1,256], index: 2, kind: output, shape index: {}, may-alias: {0,2}]  }
   0x1   :  { %9 = vsyncpa [#allocation3 + $0x1], 0 }
   0x2   :  { %10 = vsyncpa [#allocation4], 0 }
   0x3   :  { %12 = vsyncpa [#allocation4 + $0x1], 0  ;;  %s495_s9 = smov 0   ;;  %s497_s10 = smov 0  }
   0x4   :  { %s499_s11 = smov 0   ;;  %s501_s12 = smov 0  }
   0x5   :  { %s503_s13 = smov 0   ;;  %s505_s14 = smov 0  }
   0x6 LB: > { %s291_s15 = sadd.s32 4294967295, %s478_s14   ;;  %s292_s16 = sadd.s32 4294967294, %s478_s14   ;;  %s478_s14 = sphi %s505_s14, %s18_s14   ;;  %s474_s13 = sphi %s503_s13, %s629_s13   ;;  %s470_s12 = sphi %s501_s12, %s628_s12   ;;  %s466_s11 = sphi %s499_s11, %s627_s11   ;;  %s462_s10 = sphi %s497_s10, %s626_s10   ;;  %s458_s9 = sphi %s495_s9, %s625_s9  }
   0x7   : > { %s27_s17 = sadd.s32 1, %s474_s13  ;;  %s39_s18 = sadd.s32 1, %s466_s11 }
   0x8   : > { %p28_p0 = scmp.ge.s32.totalorder %s27_s17, 2  ;;  %p46_p1 = scmp.ne.s32.totalorder %s466_s11, %s462_s10 }
   0x9   : > { %p47_p2 = scmp.eq.s32.totalorder %s478_s14, 0  ;;  %p52_p3 = scmp.ne.s32.totalorder %s462_s10, %s458_s9 }
   0xa   : > { %s631_s17 = smov (%p28_p0, %s27_s17), 0  ;;  %p53_p5 = scmp.eq.s32.totalorder %s291_s15, 0 }
   0xb   : > { %p536_p4 = por %p47_p2, %p46_p1  ;;  %s34_s20 = ssub.s32 %s474_s13, %s631_s17 }
   0xc   : > { %p99_p6 = scmp.eq.s32.totalorder %s291_s15, 1  ;;  %p37_p7 = scmp.eq.s32.totalorder %s34_s20, 0 }
   0xd   : > { %p542_p8 = por %p53_p5, %p52_p3  ;;  %p105_p10 = scmp.eq.s32.totalorder %s292_s16, 1 }
   0xe   : > { %p546_p9 = por %p99_p6, %p46_p1  ;;  %p294_p12 = scmp.ge.s32.totalorder %s478_s14, 2 }
   0xf   : > { %s551_s23 = scalar_select %p37_p7, %s466_s11, %s39_s18  }
  0x10   : > { %p553_p11 = por %p105_p10, %p52_p3  ;;  %p316_p13 = scmp.lt.s32.totalorder %s478_s14, 2 }
  0x11   : > { %s128_s25 = sand.u32 1, %s466_s11   ;;  %s296_s27 = sshll.u32 %s474_s13, 1 }
  0x12   : > { %s295_s26 = sshll.u32 %s128_s25, 1  ;;  %s138_s30 = scalar_lea.hbm %s618_s0, %s296_s27 }
  0x13   : > { %s132_s3 = scalar_lea.vmem [#allocation2], %s295_s26  ;;  %s140_s5 = sshll.u32 %s138_s30, 4  ;;  %s141_s5 = int_to_ptr.hbm [resolvable:$true] %s140_s5 }
  0x14   : > { %s142_s4 = sshll.u32 %s132_s3, 4  ;;  %p309_p0 = pnand %p316_p13, %p536_p4  ;;  %s143_s4 = int_to_ptr.vmem [resolvable:$true] %s142_s4 }
  0x15   : > { %p297_p1 = scmp.ge.s32.totalorder %s478_s14, 1  ;;  %p147_p2 = scmp.lt.s32.totalorder %s478_s14, 3 }
  0x16   : > { %s129_s6 = scalar_lea.sflag [#allocation3], %s128_s25 }
  0x17   : > { %311 = dma.hbm_to_vmem [thread:$0]  (!%p309_p0), %s141_s5, 32, %s143_s4, %s129_s6  }
  0x18   : > { %p148_p3 = pnand %p297_p1, %p147_p2 }
  0x19   : > { %s569_s7 = sand.u32 (!%p148_p3), 1, %s462_s10  }
  0x1a   : > { %151 = sbr.rel (%p148_p3) target bundleno = 47 (0x2f), region = 28  ;;  %s298_s8 = sshll.u32 (!%p148_p3), %s569_s7, 1 }
  0x1b   : > { %s154_s15 = scalar_lea.sflag (!%p148_p3), [#allocation3], %s569_s7  ;;  %s157_s16 = scalar_lea.vmem (!%p148_p3), [#allocation2], %s298_s8 }
  0x1f   : > { %449 = dma.done.wait (%p542_p8), %s154_s15, 32  }
  0x20   : > { %451 = vsyncadd (%p542_p8), %s154_s15, 4294967264  ;;  %s301_s18 = sshll.u32 %s470_s12, 1  ;;  %v184_v0 = vlaneseq  ;;  %s178_s26 = scalar_lea.vmem [#allocation5], %s298_s8  ;;  %v181_v1 = vld [vmem:[%s619_s1] sm:$0x3] }
  0x21   : > { %s202_s25 = scalar_lea.hbm %s620_s2, %s301_s18  ;;  %s204_s27 = sshll.u32 %s178_s26, 4  ;;  %v182_v2 = vld [vmem:[%s157_s16] sm:$0x3]  ;;  %s205_s27 = int_to_ptr.vmem [resolvable:$true] %s204_s27 }
  0x22   : > { %s206_s28 = sshll.u32 %s202_s25, 4  ;;  %vm186_vm0 = vcmp.lt.s32.totalorder %v184_v0, 256  ;;  %v183_v3 = vadd.f32 %v182_v2, %v181_v1  ;;  %s190_s12 = scalar_lea.sflag [#allocation4], %s569_s7  ;;  %s207_s28 = int_to_ptr.hbm [resolvable:$true] %s206_s28 }
  0x23   : > { %s410_s21 = sshra.s32 %s207_s28, 4  ;;  %s416_s6 = scalar_lea.hbm %s620_s2, 4  ;;  %s411_s21 = int_to_ptr.hbm [resolvable:$true] %s410_s21 }
  0x24   : > { %188 = vst.msk [vmem:[%s178_s26] sm:$0x3] %vm186_vm0, %v183_v3  ;;  %s412_s3 = scalar_lea.hbm %s411_s21, 2  ;;  %p417_p7 = scmp.lt.s32.totalorder %s411_s21, %s620_s2 }
  0x25   : > { %p413_p4 = scmp.ne.s32.totalorder %s411_s21, %s412_s3  ;;  %p418_p8 = scmp.lt.s32.totalorder %s416_s6, %s412_s3 }
  0x27   : > { %p414_p5 = pnand %p413_p4, %p546_p9  ;;  %p419_p10 = por %p418_p8, %p417_p7 }
  0x29   : > { %p415_p6 = pneg %p414_p5 }
  0x2b   : > { %p420_p13 = pnand %p419_p10, %p415_p6 }
  0x2d   : > { %423 = shalt.err (!%p420_p13)
}
  0x2e   : > { %306 = dma.vmem_to_hbm [thread:$0]  (%p546_p9), %s205_s27, 32, %s207_s28, %s190_s12  }
  0x2f PF: > { %s218_s7 = sand.u32 1, %s458_s9   ;;  %p313_p0 = pnand %p294_p12, %p553_p11 }
  0x30   : > { %s219_s16 = scalar_lea.sflag [#allocation4], %s218_s7 }
  0x31   : > { %p314_p1 = pneg %p313_p0 }
  0x33   : > { %453 = dma.done.wait (%p314_p1), %s219_s16, 32  }
  0x34   : > { %455 = vsyncadd (%p314_p1), %s219_s16, 4294967264  ;;  %s18_s14 = sadd.s32 1, %s478_s14   ;;  %s625_s9 = smov %s462_s10 }
  0x35   : > { %p15_p2 = scmp.ge.s32.totalorder %s18_s14, 4   ;;  %s626_s10 = smov %s466_s11 }
  0x36   : > { %s627_s11 = smov %s551_s23  ;;  %s628_s12 = smov %s474_s13 }
  0x37   : > { %s629_s13 = smov %s631_s17  ;;  %17 = sbr.rel (!%p15_p2) target bundleno = 6 (0x6), region = 74 }
  0x3c   :  { %225 = vsyncpa [#allocation3], 1 }
  0x3d   :  { %227 = vsyncpa [#allocation3 + $0x1], 1 }
  0x3e   :  { %228 = vsyncpa [#allocation4], 1 }
  0x3f   :  { %230 = vsyncpa [#allocation4 + $0x1], 1 }

</bundles_post_ra>
